<compile_context>
chip_gen: v6e
topology: v6e:2x2x1
jax: 0.10.0
libtpu: 0.0.40
codegen_flags: <defaults>
</compile_context>

<pallas_src>
import functools

import numpy as np
import jax
import jax.numpy as jnp
from jax.experimental import pallas as pl
from jax.experimental.pallas import tpu as pltpu


# ----------------------------------------------------------------------------
# Small helpers
# ----------------------------------------------------------------------------
def _round_up(x, m):
    return ((x + m - 1) // m) * m


def _vmem_capacity_bytes():
    try:
        cap = int(pltpu.get_tpu_info().vmem_capacity_bytes)
        if cap > 0:
            return cap
    except Exception:
        pass
    return 64 * 1024 * 1024          # conservative fallback (v7x per-core VMEM)


def _default_vmem_limit():
    # Well above the 16/32 MiB scoped defaults, with headroom below physical.
    return int(_vmem_capacity_bytes() * 3 // 4)


# ----------------------------------------------------------------------------
# Row/col-tiled linear kernels
# ----------------------------------------------------------------------------
def _linear_bias_kernel(x_ref, w_ref, b_ref, o_ref):
    acc = jnp.dot(x_ref[...], w_ref[...], preferred_element_type=jnp.float32)
    o_ref[...] = (acc + b_ref[...].astype(jnp.float32)).astype(o_ref.dtype)


def _linear_nobias_kernel(x_ref, w_ref, o_ref):
    acc = jnp.dot(x_ref[...], w_ref[...], preferred_element_type=jnp.float32)
    o_ref[...] = acc.astype(o_ref.dtype)


def _pick_col_tile(n, target=1024):
    """Largest multiple-of-128 divisor of n that is <= target (else n)."""
    if n <= target or n % 128 != 0:
        return n
    t = (target // 128) * 128
    while t >= 128:
        if n % t == 0:
            return t
        t -= 128
    return n


def linear_pallas(x, w, bias=None, *, row_tile=512, col_tile=1024,
                  vmem_limit=None):
    """x: (M, K), w: (K, N), bias: (N,) or None. Returns (M, N)."""
    M, K = x.shape
    _, N = w.shape

    # Row tile: multiple of 8, padded M, and >= 2 grid steps when M allows
    # (v7x has 2 TensorCores; a 1-step "parallel" grid wastes half the chip).
    tm = min(row_tile, _round_up(M, 8))
    if M > 8 and _round_up(M, tm) // tm < 2:
        tm = max(8, _round_up((M + 1) // 2, 8))
    Mp = _round_up(M, tm)
    xp = x if Mp == M else jnp.pad(x, ((0, Mp - M), (0, 0)))

    tn = _pick_col_tile(N, col_tile)
    n_col = N // tn
    grid = (Mp // tm, n_col)

    x_spec = pl.BlockSpec((tm, K), lambda i, j: (i, 0))
    o_spec = pl.BlockSpec((tm, tn), lambda i, j: (i, j))
    if n_col == 1:
        # Resident weight block: single buffer, never re-fetched.
        w_spec = pl.BlockSpec((K, tn), lambda i, j: (0, j),
                              pipeline_mode=pl.Buffered(1))
    else:
        w_spec = pl.BlockSpec((K, tn), lambda i, j: (0, j))

    params = pltpu.CompilerParams(
        dimension_semantics=("parallel", "parallel"),
        vmem_limit_bytes=vmem_limit)
    out_shape = jax.ShapeDtypeStruct((Mp, N), x.dtype)

    if bias is None:
        out = pl.pallas_call(
            _linear_nobias_kernel, out_shape=out_shape, grid=grid,
            in_specs=[x_spec, w_spec], out_specs=o_spec,
            compiler_params=params)(xp, w)
    else:
        if n_col == 1:
            b_spec = pl.BlockSpec((1, tn), lambda i, j: (0, j),
                                  pipeline_mode=pl.Buffered(1))
        else:
            b_spec = pl.BlockSpec((1, tn), lambda i, j: (0, j))
        out = pl.pallas_call(
            _linear_bias_kernel, out_shape=out_shape, grid=grid,
            in_specs=[x_spec, w_spec, b_spec], out_specs=o_spec,
            compiler_params=params)(xp, w, bias.reshape(1, N))
    return out if Mp == M else out[:M]


# ----------------------------------------------------------------------------
# Window-attention kernel: T windows per grid step, per-head-group processing
# ----------------------------------------------------------------------------
def _window_attn_kernel(qkv_ref, islast_ref, bias_ref, mask_ref, o_ref, *,
                        heads, head_dim, inv_scale, shifted, swin_ver):
    C = heads * head_dim
    D = head_dim
    bias = bias_ref[...][None, :, :]                        # (1, W, W) f32
    if shifted:
        # branchless: per-window indicator (T,1,1) * finite -1e9 mask (W,W)
        add_bias = bias + islast_ref[...] * mask_ref[...]   # (T, W, W)
    else:
        add_bias = bias                                      # (1, W, W)

    # Heads in groups of G = 128 // D: one 128-lane-aligned (T, W, 128) ref
    # load per q/k/v group (no full-tile materialisation) and one 128-lane
    # store per group (no end-of-kernel concat, no masked sub-128 stores when
    # C >= 128).  Per-head slices only touch the already-loaded group value.
    grp = max(1, 128 // D) if D < 128 else 1
    h0 = 0
    while h0 < heads:
        hc = min(grp, heads - h0)
        gw = hc * D
        lo = h0 * D
        qg = qkv_ref[:, :, lo:lo + gw]                       # (T, W, gw)
        kg = qkv_ref[:, :, C + lo:C + lo + gw]
        vg = qkv_ref[:, :, 2 * C + lo:2 * C + lo + gw]

        outs = []
        for hh in range(hc):
            s0, s1 = hh * D, (hh + 1) * D
            v = vg[:, :, s0:s1]                              # (T, W, D)
            if swin_ver == 2:
                qf = qg[:, :, s0:s1].astype(jnp.float32)
                kf = kg[:, :, s0:s1].astype(jnp.float32)
                qf = qf * jax.lax.rsqrt(
                    jnp.maximum(jnp.sum(qf * qf, -1, keepdims=True), 1e-24))
                kf = kf * jax.lax.rsqrt(
                    jnp.maximum(jnp.sum(kf * kf, -1, keepdims=True), 1e-24))
                q = (qf * inv_scale).astype(qg.dtype)
                k = kf.astype(kg.dtype)
            else:
                q = qg[:, :, s0:s1] * inv_scale              # scale folded into q
                k = kg[:, :, s0:s1]

            # batched (over windows) q @ k^T, f32 accumulation, no transpose
            dots = jnp.einsum("bid,bjd->bij", q, k,
                              preferred_element_type=jnp.float32)  # (T, W, W)
            dots = dots + add_bias

            m = jnp.max(dots, axis=-1, keepdims=True)
            p = jnp.exp(dots - m)
            denom = jnp.sum(p, axis=-1, keepdims=True)
            attn = (p * pl.reciprocal(denom, approx=True)).astype(v.dtype)

            oh = jnp.einsum("bij,bjd->bid", attn, v,
                            preferred_element_type=jnp.float32)    # (T, W, D)
            outs.append(oh.astype(o_ref.dtype))              # cast asap

        grp_out = outs[0] if hc == 1 else jnp.concatenate(outs, axis=-1)
        o_ref[:, :, lo:lo + gw] = grp_out                    # lane-aligned store
        h0 += hc


def _pick_block_windows(n_win, W, C, dtype_bytes, target=64):
    """Generation-aware window-block size from the chip's VMEM capacity."""
    vmem = _vmem_capacity_bytes()
    # Double-buffered qkv-in (3C) + out (C) blocks; keep pipeline buffers to
    # ~1/4 of capacity, leaving the rest for in-kernel live values / scratch.
    per_win = 2 * W * (3 * C + C) * dtype_bytes
    t = int(max(1, min(target, (vmem // 4) // max(per_win, 1))))
    t = min(t, n_win)
    if n_win >= 2:
        t = min(t, (n_win + 1) // 2)     # keep >= 2 grid steps (v7x megacore)
    return max(t, 1)


def window_attention_pallas(qkv, win_is_last, bias, mask, *, heads, head_dim,
                            inv_scale, shifted, swin_ver, block_windows=64,
                            vmem_limit=None):
    """qkv: (NWIN, W, 3C); win_is_last: (NWIN,1,1) f32; bias/mask: (W, W) f32."""
    NWIN, W, C3 = qkv.shape
    C = heads * head_dim
    assert C3 == 3 * C
    T = _pick_block_windows(NWIN, W, C, qkv.dtype.itemsize, target=block_windows)
    NWINp = _round_up(NWIN, T)
    if NWINp != NWIN:     # pad rather than shrink the tile to an odd divisor
        qkv = jnp.pad(qkv, ((0, NWINp - NWIN), (0, 0), (0, 0)))
        win_is_last = jnp.pad(win_is_last, ((0, NWINp - NWIN), (0, 0), (0, 0)))

    kern = functools.partial(_window_attn_kernel, heads=heads,
                             head_dim=head_dim, inv_scale=inv_scale,
                             shifted=shifted, swin_ver=swin_ver)

    def const_spec(shape):
        return pl.BlockSpec(shape, lambda i: (0, 0),
                            pipeline_mode=pl.Buffered(1))

    out = pl.pallas_call(
        kern,
        out_shape=jax.ShapeDtypeStruct((NWINp, W, C), qkv.dtype),
        grid=(NWINp // T,),
        in_specs=[
            pl.BlockSpec((T, W, C3), lambda i: (i, 0, 0)),
            pl.BlockSpec((T, 1, 1), lambda i: (i, 0, 0)),
            const_spec((W, W)),
            const_spec((W, W)),
        ],
        out_specs=pl.BlockSpec((T, W, C), lambda i: (i, 0, 0)),
        compiler_params=pltpu.CompilerParams(
            dimension_semantics=("parallel",),
            vmem_limit_bytes=vmem_limit),
    )(qkv, win_is_last, bias, mask)
    return out[:NWIN] if NWINp != NWIN else out


# ----------------------------------------------------------------------------
# Module glue (plain JAX): shift, pos-bias gather, reshapes (all layout-free)
# ----------------------------------------------------------------------------
def create_mask_np(window_size, displacement, neg=-np.inf):
    assert 0 < displacement < window_size
    mask = np.zeros((window_size, window_size), dtype=np.float32)
    mask[-displacement:, :-displacement] = neg
    mask[:-displacement, -displacement:] = neg
    return mask


def relative_indices_np(window_size):
    row = np.arange(window_size)[:, None]
    col = np.arange(window_size)[None, :]
    return (col - row) + window_size - 1   # (W, W) in [0, 2W-2]


def window_attention_forward(x, params, *, heads, head_dim, window_size,
                             shifted, relative_pos_embedding, swin_ver=1,
                             block_windows=64, row_tile=512):
    b, n, c = x.shape
    inner = heads * head_dim
    assert inner == c and n % window_size == 0
    W = window_size
    nw = n // W
    vmem_limit = _default_vmem_limit()

    if shifted:
        disp = W // 2
        assert 0 < disp < W
        x = jnp.roll(x, -disp, axis=1)

    # qkv projection (tiled Pallas matmul, no bias in the module)
    qkv = linear_pallas(x.reshape(b * n, c), params["w_qkv"].astype(x.dtype),
                        None, row_tile=row_tile, vmem_limit=vmem_limit)
    # b (nw w) (3c) -> (b nw) w (3c): free reshape, no HBM transpose
    qkv = qkv.reshape(b * nw, W, 3 * c)

    # relative position bias, kept in f32 end-to-end
    if relative_pos_embedding:
        rel = jnp.asarray(relative_indices_np(W))
        bias = params["pos_embedding"][rel, rel].astype(jnp.float32)
    else:
        bias = jnp.zeros((W, W), jnp.float32)

    if shifted:
        mask = jnp.asarray(create_mask_np(W, W // 2, neg=-1e9))
        win_is_last = jnp.asarray(
            ((np.arange(b * nw) % nw) == (nw - 1)).astype(np.float32)
        ).reshape(b * nw, 1, 1)
    else:
        mask = jnp.zeros((W, W), jnp.float32)
        win_is_last = jnp.zeros((b * nw, 1, 1), jnp.float32)

    # TODO(synk): scale / tau passed as a static python float; wrap as an SMEM
    # scalar input if this forward ever needs to run under jit with traced tau.
    scale = float(head_dim ** 0.5) if swin_ver == 1 else float(params["tau"])

    out = window_attention_pallas(qkv, win_is_last, bias, mask, heads=heads,
                                  head_dim=head_dim, inv_scale=1.0 / scale,
                                  shifted=shifted, swin_ver=swin_ver,
                                  block_windows=block_windows,
                                  vmem_limit=vmem_limit)

    # (b nw) w (h d) -> b (nw w) (h d): free reshape
    out = out.reshape(b * n, inner)
    out = linear_pallas(out, params["w_out"].astype(x.dtype),
                        params["b_out"].astype(x.dtype),
                        row_tile=row_tile, vmem_limit=vmem_limit)
    return out.reshape(b, n, c)


# ----------------------------------------------------------------------------
# Pure-JAX reference for verification (mirrors the PyTorch module)
# ----------------------------------------------------------------------------
def window_attention_ref(x, params, *, heads, head_dim, window_size,
                         shifted, relative_pos_embedding, swin_ver=1,
                         **_unused):
    b, n, c = x.shape
    inner = heads * head_dim
    nw = n // window_size
    W = window_size
    if shifted:
        x = jnp.roll(x, -(W // 2), axis=1)
    qkv = x @ params["w_qkv"]
    q, k, v = jnp.split(qkv, 3, axis=-1)

    def rearr(t):
        t = t.reshape(b, nw, W, heads, head_dim)
        return jnp.transpose(t, (0, 3, 1, 2, 4))  # b h nw w d

    q, k, v = map(rearr, (q, k, v))
    if swin_ver == 2:
        q = q / jnp.maximum(jnp.linalg.norm(q, axis=-1, keepdims=True), 1e-12)
        k = k / jnp.maximum(jnp.linalg.norm(k, axis=-1, keepdims=True), 1e-12)
        scale = params["tau"]
    else:
        scale = head_dim ** 0.5
    dots = jnp.einsum("bhwid,bhwjd->bhwij", q, k) / scale
    if relative_pos_embedding:
        rel = jnp.asarray(relative_indices_np(W))
        dots = dots + params["pos_embedding"][rel, rel]
    if shifted:
        mask = jnp.asarray(create_mask_np(W, W // 2))
        dots = dots.at[:, :, -1:].add(mask)
    attn = jax.nn.softmax(dots, axis=-1)
    out = jnp.einsum("bhwij,bhwjd->bhwid", attn, v)
    out = jnp.transpose(out, (0, 2, 3, 1, 4)).reshape(b, n, inner)
    return out @ params["w_out"] + params["b_out"]


# ----------------------------------------------------------------------------
if __name__ == "__main__":
    # small config consistent with the module
    batch, seq = 2, 16
    heads, head_dim = 4, 8
    dim = heads * head_dim          # 32
    window_size = 8                 # nw = 2

    key = jax.random.PRNGKey(0)
    kx, kqkv, kout, kbias, kpos = jax.random.split(key, 5)

    x = jax.random.normal(kx, (batch, seq, dim), dtype=jnp.float32)
    params = {
        # stored as (in, out) == transposed PyTorch Linear weights
        "w_qkv": 0.05 * jax.random.normal(kqkv, (dim, 3 * dim), jnp.float32),
        "w_out": 0.05 * jax.random.normal(kout, (dim, dim), jnp.float32),
        "b_out": 0.05 * jax.random.normal(kbias, (dim,), jnp.float32),
        "pos_embedding": jax.random.normal(
            kpos, (2 * window_size - 1, 2 * window_size - 1), jnp.float32),
        "tau": 0.01,  # only used for swin_ver=2
    }

    configs = [
        dict(heads=heads, head_dim=head_dim, window_size=window_size,
             shifted=True, relative_pos_embedding=True, swin_ver=1),
        dict(heads=heads, head_dim=head_dim, window_size=window_size,
             shifted=True, relative_pos_embedding=True, swin_ver=2),
        dict(heads=heads, head_dim=head_dim, window_size=window_size,
             shifted=False, relative_pos_embedding=False, swin_ver=1),
    ]

    for kwargs in configs:
        out = jax.block_until_ready(
            window_attention_forward(x, params, **kwargs))
        ref = jax.block_until_ready(window_attention_ref(x, params, **kwargs))
        assert out.shape == (batch, seq, dim)
        # 2e-3 tolerance accommodates the EUP approx reciprocal in the softmax.
        assert np.allclose(np.asarray(out), np.asarray(ref),
                           rtol=2e-3, atol=2e-3), \
            f"Pallas output does not match reference for {kwargs}"

    # bf16 smoke run (halved HBM traffic path); softmax math stays f32.
    xb = x.astype(jnp.bfloat16)
    pb = dict(params)
    pb["w_qkv"] = params["w_qkv"].astype(jnp.bfloat16)
    pb["w_out"] = params["w_out"].astype(jnp.bfloat16)
    pb["b_out"] = params["b_out"].astype(jnp.bfloat16)
    outb = jax.block_until_ready(window_attention_forward(xb, pb, **configs[0]))
    assert outb.dtype == jnp.bfloat16
    assert bool(jnp.isfinite(outb.astype(jnp.float32)).all())

    print("KERNEL_OK")
</pallas_src>

<mosaic_0001>
module attributes {stable_mosaic.version = 11 : i64} {
  func.func @_linear_nobias_kernel(%arg0: i32, %arg1: i32, %arg2: memref<16x32xf32, #tpu.memory_space<vmem>>, %arg3: memref<32x96xf32, #tpu.memory_space<vmem>>, %arg4: memref<16x96xf32, #tpu.memory_space<vmem>>) attributes {dimension_semantics = [#tpu.dimension_semantics<parallel>, #tpu.dimension_semantics<parallel>], iteration_bounds = array<i64: 2, 1>, scalar_prefetch = 0 : i64, scratch_operands = 0 : i64, tpu.core_type = #tpu.core_type<tc>, window_params = [{transform_indices = @transform_0, window_bounds = array<i64: 16, 32>}, {pipeline_mode = #tpu.pipeline_mode<synchronous>, transform_indices = @transform_1, window_bounds = array<i64: 32, 96>}, {transform_indices = @transform_2, window_bounds = array<i64: 16, 96>}]} {
    %c0 = arith.constant 0 : index
    %c0_0 = arith.constant 0 : index
    %0 = vector.load %arg2[%c0, %c0_0] : memref<16x32xf32, #tpu.memory_space<vmem>>, vector<16x32xf32>
    %c0_1 = arith.constant 0 : index
    %c0_2 = arith.constant 0 : index
    %1 = vector.load %arg3[%c0_1, %c0_2] : memref<32x96xf32, #tpu.memory_space<vmem>>, vector<32x96xf32>
    %cst = arith.constant dense<0.000000e+00> : vector<16x96xf32>
    %2 = tpu.matmul %0, %1, %cst {dimension_numbers = #tpu.dot_dimension_numbers<[1], [0], [0], [1], [0, 0, 1, 1], [], []>} : vector<16x32xf32>, vector<32x96xf32>, vector<16x96xf32> -> vector<16x96xf32>
    %c0_3 = arith.constant 0 : index
    %c0_4 = arith.constant 0 : index
    %3 = vector.load %arg4[%c0_3, %c0_4] : memref<16x96xf32, #tpu.memory_space<vmem>>, vector<16x96xf32>
    tpu.vector_store %arg4[%c0_3, %c0_4], %2 {strides = array<i32>} : memref<16x96xf32, #tpu.memory_space<vmem>>, vector<16x96xf32>,
    return
  }
  func.func @transform_0(%arg0: i32, %arg1: i32) -> (i32, i32) {
    %c0_i32 = arith.constant 0 : i32
    %c0_i32_0 = arith.constant 0 : i32
    return %arg0, %c0_i32 : i32, i32
  }
  func.func @transform_1(%arg0: i32, %arg1: i32) -> (i32, i32) {
    %c0_i32 = arith.constant 0 : i32
    %c0_i32_0 = arith.constant 0 : i32
    return %c0_i32, %arg1 : i32, i32
  }
  func.func @transform_2(%arg0: i32, %arg1: i32) -> (i32, i32) {
    %c0_i32 = arith.constant 0 : i32
    return %arg0, %arg1 : i32, i32
  }
}

</mosaic_0001>

<bundles_post_ra>
// kernel: tpu_custom_call.1
= control target key start
LH: loop header
LB: loop body
LE: loop exit
PB: predicated region body
PF: predicated region fallthrough
CT: control target
= control target key end

     0   :  { %7 = vsyncpa [#allocation3], 0  ;;  %s867_s0 = inlined_call_operand.hbm [shape: f32[32,32], index: 0, kind: input, shape index: {}]   ;;  %s868_s1 = inlined_call_operand.hbm [shape: f32[32,96], index: 1, kind: input, shape index: {}]   ;;  %s869_s2 = inlined_call_operand.hbm [shape: f32[32,96], index: 2, kind: output, shape index: {}]  }
   0x1   :  { %9 = vsyncpa [#allocation3 + $0x1], 0 }
   0x2   :  { %10 = vsyncpa [#allocation6], 0 }
   0x3   :  { %11 = vsyncpa [#allocation4], 0 }
   0x4   :  { %13 = vsyncpa [#allocation4 + $0x1], 0  ;;  %s678_s9 = smov 0   ;;  %s680_s10 = smov 0  }
   0x5   :  { %s682_s11 = smov 0   ;;  %s684_s12 = smov 0  }
   0x6   :  { %s686_s13 = smov 0   ;;  %s688_s14 = smov 0  }
   0x7 LB: > { %s401_s15 = sadd.s32 4294967295, %s654_s14   ;;  %s402_s16 = sadd.s32 4294967294, %s654_s14   ;;  %s654_s14 = sphi %s688_s14, %s19_s14   ;;  %s650_s13 = sphi %s686_s13, %s889_s13   ;;  %s646_s12 = sphi %s684_s12, %s888_s12   ;;  %s642_s11 = sphi %s682_s11, %s887_s11   ;;  %s638_s10 = sphi %s680_s10, %s886_s10   ;;  %s634_s9 = sphi %s678_s9, %s885_s9  }
   0x8   : > { %p51_p0 = scmp.ne.s32.totalorder %s638_s10, %s634_s9  ;;  %p712_p1 = scmp.eq.s32.totalorder %s401_s15, 0 }
   0x9   : > { %p716_p2 = scmp.eq.s32.totalorder %s401_s15, 1  ;;  %p109_p3 = scmp.eq.s32.totalorder %s402_s16, 1 }
   0xa   : > { %p722_p4 = por %p712_p1, %p51_p0  ;;  %p403_p5 = scmp.ge.s32.totalorder %s654_s14, 1 }
   0xb   : > { %p727_p6 = por %p109_p3, %p51_p0  ;;  %p116_p7 = scmp.lt.s32.totalorder %s654_s14, 3 }
   0xc   : > { %s874_s19 = scalar_select %p722_p4, 1, 0 }
   0xd   : > { %s875_s20 = scalar_select %p727_p6, 1, 0 }
   0xe   : > { %p732_p8 = pnand %p403_p5, %p116_p7  ;;  %s656_s22 = smov [#allocation5]  }
   0xf   : > { %s130_s23 = sshll.u32 %s656_s22, 4  ;;  %s31_s25 = sadd.s32 1, %s650_s13  ;;  %s131_s23 = int_to_ptr.vmem [resolvable:$true] %s130_s23 }
  0x10   : > { %p447_p9 = pneg %p732_p8  ;;  %s527_s26 = scalar_lea.vmem %s131_s23, 512 }
  0x11   : > { %p528_p13 = scmp.ne.s32.totalorder %s131_s23, %s527_s26  ;;  %p535_p5 = scmp.lt.s32.totalorder %s131_s23, %s131_s23 }
  0x12   : > { %p741_p11 = pnand %p447_p9, %p712_p1  ;;  %p536_p7 = scmp.lt.s32.totalorder %s527_s26, %s527_s26 }
  0x14   : > { %p518_p12 = pneg %p741_p11  ;;  %p537_p6 = por %p536_p7, %p535_p5 }
  0x16   : > { %p530_p0 = pnand %p528_p13, %p518_p12 }
  0x18   : > { %p531_p3 = pneg %p530_p0 }
  0x1a   : > { %p538_p4 = pnand %p537_p6, %p531_p3 }
  0x1c   : > { %541 = shalt.err (!%p538_p4)
}
  0x1d   : > { %s871_s27 = smov 128   ;;  %s658_s28 = smov 8  }
  0x1e   : > { %450 = dma.hbm_to_vmem [thread:$0]  (!%p741_p11), %s868_s1, 512, %s131_s23, [#allocation6], %s871_s27, %s871_s27, %s658_s28  }
  0x1f   : > { %p33_p4 = scmp.ge.s32.totalorder %s31_s25, 2  ;;  %s38_s3 = sadd.s32 1, %s642_s11 }
  0x20   : > { %p45_p6 = scmp.ne.s32.totalorder %s642_s11, %s638_s10  ;;  %p46_p9 = scmp.eq.s32.totalorder %s654_s14, 0 }
  0x21   : > { %s891_s25 = smov (%p33_p4, %s31_s25), 0  ;;  %p460_p0 = scmp.lt.s32.totalorder %s654_s14, 2 }
  0x22   : > { %p762_p12 = por %p46_p9, %p45_p6  ;;  %p768_p13 = por %p716_p2, %p45_p6 }
  0x23   : > { %s35_s6 = ssub.s32 %s650_s13, %s891_s25  ;;  %s144_s7 = sand.u32 1, %s642_s11  }
  0x24   : > { %p36_p11 = scmp.eq.s32.totalorder %s35_s6, 0  ;;  %s406_s8 = sshll.u32 %s144_s7, 4 }
  0x25   : > { %s420_s16 = sshll.u32 %s650_s13, 8  ;;  %s148_s26 = scalar_lea.vmem [#allocation2], %s406_s8 }
  0x26   : > { %s777_s15 = scalar_select %p36_p11, %s642_s11, %s38_s3  }
  0x27   : > { %s154_s24 = scalar_lea.hbm %s867_s0, %s420_s16  ;;  %s155_s29 = sshll.u32 %s148_s26, 4  ;;  %s156_s29 = int_to_ptr.vmem [resolvable:$true] %s155_s29 }
  0x28   : > { %p785_p2 = pnand %p460_p0, %p762_p12  ;;  %s145_s30 = scalar_lea.sflag [#allocation3], %s144_s7 }
  0x29   : > { %s555_s6 = scalar_lea.vmem %s156_s29, 256  ;;  %s659_s3 = smov [#allocation2]  }
  0x2a   : > { %p544_p3 = pneg %p785_p2  ;;  %p556_p5 = scmp.ne.s32.totalorder %s156_s29, %s555_s6 }
  0x2b   : > { %s560_s27 = sshll.u32 %s659_s3, 4  ;;  %s561_s27 = int_to_ptr.vmem [resolvable:$false] %s560_s27 }
  0x2c   : > { %p558_p7 = pnand %p556_p5, %p544_p3  ;;  %s562_s16 = scalar_lea.vmem %s561_s27, 512 }
  0x2d   : > { %p563_p6 = scmp.lt.s32.totalorder %s156_s29, %s561_s27  ;;  %p564_p9 = scmp.lt.s32.totalorder %s562_s16, %s555_s6 }
  0x2e   : > { %p559_p4 = pneg %p558_p7 }
  0x2f   : > { %p565_p11 = por %p564_p9, %p563_p6 }
  0x31   : > { %p566_p10 = pnand %p565_p11, %p559_p4 }
  0x33   : > { %569 = shalt.err (!%p566_p10)
}
  0x34   : > { %s881_s4 = smov 128   ;;  %167 = sbr.rel (%p732_p8) target bundleno = 278 (0x116), region = 28 }
  0x35   : > { %454 = dma.hbm_to_vmem [thread:$0]  (!%p785_p2), %s154_s24, 256, %s156_s29, %s145_s30, %s881_s4, %s881_s4, %s658_s28  }
  0x36   : > { %s799_s7 = sand.u32 (!%p732_p8), 1, %s638_s10   ;;  %p882_p12 = scmp.ne.s32.totalorder (!%p732_p8), %s874_s19, 0 }
  0x37   : > { %s410_s27 = sshll.u32 (!%p732_p8), %s799_s7, 4  ;;  %s170_s8 = scalar_lea.sflag (!%p732_p8), [#allocation3], %s799_s7 }
  0x38   : > { %s173_s22 = scalar_lea.vmem (!%p732_p8), [#allocation2], %s410_s27 }
  0x39   : > { %621 = dma.done.wait (%p882_p12), %s170_s8, 256  }
  0x3a   : > { %623 = vsyncadd (%p882_p12), %s170_s8, 4294967040 }
  0x3b   : > { %625 = dma.done.wait (%p712_p1), [#allocation6], 512  }
  0x3c   : > { %627 = vsyncadd (%p712_p1), [#allocation6], 4294966784  ;;  %vm206_vm0 = vcmask 261120   ;;  %v205_v0 = vld [vmem:[#allocation5 + $0x18] sm:$0xff]  ;;  %v204_v1 = vld [vmem:[#allocation5 + $0x10] sm:$0xff]  ;;  %s197_s17 = scalar_lea.vmem [#allocation7], %s410_s27 }
  0x3d   : > { %428 = vmatprep.subr.mxu0 %v205_v0  ;;  %v200_v2 = vld [vmem:[%s173_s22] sm:$0xff]  ;;  %v203_v3 = vld [vmem:[#allocation5 + $0x8] sm:$0xff]  ;;  %s306_s19 = sshll.u32 %s197_s17, 4  ;;  %s421_s21 = sshll.u32 %s646_s12, 8  ;;  %vm288_vm1 = vcmask 785408   ;;  %s814_s19 = int_to_ptr.vmem [resolvable:$true] %s306_s19 }
  0x3e   : > { %429 = vmatpush3.msra.mxu0 %v205_v0  ;;  %436 = vmatprep.mubr.msk.f32.mxu0 %vm206_vm0, %v200_v2  ;;  %v202_v4 = vld [vmem:[#allocation5] sm:$0xff]  ;;  %v201_v5 = vld [vmem:[%s173_s22 + $0x8] sm:$0xff]  ;;  %s819_s24 = scalar_lea.hbm %s869_s2, %s421_s21  ;;  %s292_s26 = scalar_lea.sflag [#allocation4], %s799_s7 }
  0x3f   : > { %430 = vmatprep.subr.mxu0 %v204_v1  ;;  %s570_s29 = scalar_lea.vmem %s814_s19, 256  ;;  %s660_s12 = smov [#allocation7]  }
  0x40   : > { %431 = vmatpush3.msra.mxu0 %v204_v1  ;;  %p571_p1 = scmp.ne.s32.totalorder %s814_s19, %s570_s29  ;;  %s574_s18 = sshll.u32 %s660_s12, 4  ;;  %s575_s18 = int_to_ptr.vmem [resolvable:$false] %s574_s18 }
  0x41   : > { %432 = vmatprep.subr.mxu0 %v203_v3  ;;  %s576_s30 = scalar_lea.vmem %s575_s18, 512  ;;  %p577_p0 = scmp.lt.s32.totalorder %s814_s19, %s575_s18 }
  0x42   : > { %433 = vmatpush3.msra.mxu0 %v203_v3  ;;  %p572_p8 = pnand %p571_p1, %p768_p13  ;;  %p578_p2 = scmp.lt.s32.totalorder %s576_s30, %s570_s29 }
  0x43   : > { %434 = vmatprep.subr.mxu0 %v202_v4 }
  0x44   : > { %435 = vmatpush3.msra.mxu0 %v202_v4  ;;  %p573_p10 = pneg %p572_p8  ;;  %p579_p3 = por %p578_p2, %p577_p0 }
  0x45   : > { %437 = vmatmul.mubr.msk.f32.vlgmr.msra.gmra.mxu0 %vm206_vm0, %v201_v5 }
  0x46   : > { %p580_p5 = pnand %p579_p3, %p573_p10 }
 0x105   : > { %v438_v6 = vpop.f32.mrf.mxu0 }
 0x106   : > { %290 = vst.msk [vmem:[%s197_s17 + $0x8] sm:$0xff] %vm288_vm1, %v438_v6 }
 0x107   : > { %v279_v7 = vpop.f32.mrf.mxu0 }
 0x108   : > { %289 = vst.msk [vmem:[%s197_s17] sm:$0xff] %vm288_vm1, %v279_v7 }
 0x109   : > { %583 = shalt.err (!%p580_p5)
}
 0x10a   : > { %s584_s6 = scalar_lea.hbm %s819_s24, 256  ;;  %s588_s4 = scalar_lea.hbm %s869_s2, 512 }
 0x10b   : > { %p585_p7 = scmp.ne.s32.totalorder %s819_s24, %s584_s6  ;;  %p589_p9 = scmp.lt.s32.totalorder %s819_s24, %s869_s2 }
 0x10c   : > { %p590_p11 = scmp.lt.s32.totalorder %s588_s4, %s584_s6 }
 0x10d   : > { %p586_p4 = pnand %p585_p7, %p768_p13 }
 0x10e   : > { %p591_p12 = por %p590_p11, %p589_p9 }
 0x10f   : > { %p587_p6 = pneg %p586_p4 }
 0x111   : > { %p592_p1 = pnand %p591_p12, %p587_p6 }
 0x113   : > { %595 = shalt.err (!%p592_p1)
}
 0x114   : > { %s661_s22 = smov 128   ;;  %s662_s17 = smov 8  }
 0x115   : > { %445 = dma.vmem_to_hbm [thread:$0]  (%p768_p13), %s814_s19, 256, %s819_s24, %s292_s26, %s661_s22, %s661_s22, %s662_s17  }
 0x116 PF: > { %s321_s21 = sand.u32 1, %s634_s9   ;;  %p883_p8 = scmp.ne.s32.totalorder %s875_s20, 0 }
 0x117   : > { %p884_p10 = scmp.ge.s32.totalorder %s654_s14, 2  ;;  %s322_s28 = scalar_lea.sflag [#allocation4], %s321_s21 }
 0x119   : > { %p456_p0 = pnand %p884_p10, %p883_p8 }
 0x11b   : > { %p457_p2 = pneg %p456_p0 }
 0x11d   : > { %629 = dma.done.wait (%p457_p2), %s322_s28, 256  }
 0x11e   : > { %631 = vsyncadd (%p457_p2), %s322_s28, 4294967040  ;;  %s19_s14 = sadd.s32 1, %s654_s14   ;;  %s885_s9 = smov %s638_s10 }
 0x11f   : > { %p16_p3 = scmp.ge.s32.totalorder %s19_s14, 4   ;;  %s886_s10 = smov %s642_s11 }
 0x120   : > { %s887_s11 = smov %s777_s15  ;;  %s888_s12 = smov %s650_s13 }
 0x121   : > { %s889_s13 = smov %s891_s25  ;;  %18 = sbr.rel (!%p16_p3) target bundleno = 7 (0x7), region = 78 }
 0x126   :  { %327 = vsyncpa [#allocation3], 1 }
 0x127   :  { %329 = vsyncpa [#allocation3 + $0x1], 1 }
 0x128   :  { %330 = vsyncpa [#allocation6], 1 }
 0x129   :  { %331 = vsyncpa [#allocation4], 1 }
 0x12a   :  { %333 = vsyncpa [#allocation4 + $0x1], 1 }

</bundles_post_ra>
